<compile_context>
chip_gen: v6e
topology: v6e:2x2x1
jax: 0.10.0
libtpu: 0.0.40
codegen_flags: <defaults>
</compile_context>

<pallas_src>
import jax
import jax.numpy as jnp
from jax.experimental import pallas as pl
from jax.experimental.pallas import tpu as pltpu

_MiB = 1024 * 1024


def _se_kernel(x_ref, w1t_ref, b1_ref, w2t_ref, b2_ref, o_ref):
    # Squeeze: AdaptiveAvgPool2d(1) == mean over the flattened spatial (lane)
    # axis, accumulated in f32 regardless of the streaming dtype.
    pooled = jnp.mean(x_ref[...], axis=2, dtype=jnp.float32)            # (nb, C)

    # Excite: the two 1x1 convs are dense matmuls over channels, batched over
    # the nb samples of this block (one real MXU tile per matmul).
    s1 = jnp.dot(pooled, w1t_ref[...],
                 preferred_element_type=jnp.float32) + b1_ref[...]      # (nb, Cr)
    s1 = s1 * jax.nn.sigmoid(s1)                                        # Swish
    s2 = jnp.dot(s1, w2t_ref[...],
                 preferred_element_type=jnp.float32) + b2_ref[...]      # (nb, C)
    scale = jax.nn.sigmoid(s2)                                          # (nb, C)

    # Re-weight: re-read x (short live range) and broadcast the per-(sample,
    # channel) scale across all spatial positions.
    o_ref[...] = (x_ref[...] * scale[:, :, None].astype(o_ref.dtype)
                  ).astype(o_ref.dtype)


def _round_up(a, b):
    return (a + b - 1) // b * b


def _vmem_capacity_bytes():
    try:
        return int(pltpu.get_tpu_info().vmem_capacity_bytes)
    except Exception:
        return 64 * _MiB  # conservative fallback: v7x per-TensorCore VMEM


def _padded_tile_bytes(rows, cols, itemsize, leading=1):
    """VMEM footprint of a (leading, rows, cols) tile with (8,128) layout padding."""
    sublane = {4: 8, 2: 16, 1: 32}.get(itemsize, 8)
    return (leading * _round_up(max(rows, 1), sublane)
            * _round_up(max(cols, 1), 128) * itemsize)


def _choose_batch_block(n, bytes_per_sample, budget_bytes):
    """Pick the per-grid-step batch block Nb purely from the byte budget, while
    keeping >= 4 grid steps when the batch allows (>= 2 pipelined steps per v7x
    TensorCore via the 'parallel' axis)."""
    nb = max(1, budget_bytes // max(1, bytes_per_sample))
    min_steps = 4 if n >= 4 else n
    if min_steps > 1:
        nb = min(nb, max(1, n // min_steps))
    return int(max(1, min(nb, n)))


def squeeze_excitation(x, w1, b1, w2, b2):
    """EfficientNet-style Squeeze-Excitation.

    x  : (N, C, H, W)
    w1 : (Cr, C)   squeezed Conv2d(C -> Cr, 1x1) weight
    b1 : (Cr,)     its bias
    w2 : (C, Cr)   squeezed Conv2d(Cr -> C, 1x1) weight
    b2 : (C,)      its bias
    Returns x * sigmoid(w2 @ swish(w1 @ mean_hw(x) + b1) + b2).
    """
    N, C, H, W = x.shape
    HW = H * W
    Cr = w1.shape[0]
    itemsize = x.dtype.itemsize

    # Generation-aware budgets: bigger blocks -> closer to HBM roofline.
    vmem_cap = _vmem_capacity_bytes()
    block_budget = 8 * _MiB if vmem_cap >= 96 * _MiB else 4 * _MiB

    bytes_per_sample = _padded_tile_bytes(C, HW, itemsize)
    nb = _choose_batch_block(N, bytes_per_sample, block_budget)

    n_steps = pl.cdiv(N, nb)
    n_pad = n_steps * nb

    x2 = x.reshape(N, C, HW)                 # free: no data movement
    if n_pad != N:
        # Zero-padded samples produce finite scales and zero outputs; they are
        # sliced off below and never contaminate the real rows.
        x2 = jnp.pad(x2, ((0, n_pad - N), (0, 0), (0, 0)))

    # Pre-transpose weights so in-kernel matmuls are (nb,C)@(C,Cr) / (nb,Cr)@(Cr,C).
    w1t = w1.T                               # (C, Cr)
    w2t = w2.T                               # (Cr, C)
    b1r = b1.reshape(1, Cr)
    b2r = b2.reshape(1, C)

    block_bytes = nb * bytes_per_sample
    weight_bytes = 2 * (_padded_tile_bytes(C, Cr, w1t.dtype.itemsize)
                        + _padded_tile_bytes(Cr, C, w2t.dtype.itemsize)
                        + _padded_tile_bytes(1, Cr, b1r.dtype.itemsize)
                        + _padded_tile_bytes(1, C, b2r.dtype.itemsize))
    # 2x(in) + 2x(out) double-buffered x blocks + resident weights + headroom.
    needed = 4 * block_bytes + weight_bytes + 2 * _MiB
    vmem_limit = max(32 * _MiB, needed)                   # lift v5e's 16 MiB default
    vmem_limit = int(min(vmem_limit, vmem_cap - 8 * _MiB))  # physical headroom

    out = pl.pallas_call(
        _se_kernel,
        out_shape=jax.ShapeDtypeStruct((n_pad, C, HW), x.dtype),
        grid_spec=pltpu.PrefetchScalarGridSpec(
            num_scalar_prefetch=0,
            grid=(n_steps,),
            in_specs=[
                pl.BlockSpec((nb, C, HW), lambda i: (i, 0, 0)),   # x (streamed)
                pl.BlockSpec((C, Cr), lambda i: (0, 0)),          # w1.T (resident)
                pl.BlockSpec((1, Cr), lambda i: (0, 0)),          # b1  (resident)
                pl.BlockSpec((Cr, C), lambda i: (0, 0)),          # w2.T (resident)
                pl.BlockSpec((1, C), lambda i: (0, 0)),           # b2  (resident)
            ],
            out_specs=pl.BlockSpec((nb, C, HW), lambda i: (i, 0, 0)),
        ),
        compiler_params=pltpu.CompilerParams(
            dimension_semantics=("parallel",),
            vmem_limit_bytes=vmem_limit,
        ),
    )(x2, w1t, b1r, w2t, b2r)

    return out[:N].reshape(N, C, H, W)


def squeeze_excitation_ref(x, w1, b1, w2, b2):
    """Pure-JAX reference mirroring the PyTorch module semantics."""
    pooled = jnp.mean(x, axis=(2, 3))                     # (N, C)
    s1 = pooled @ w1.T + b1.reshape(1, -1)                # (N, Cr)
    s1 = s1 * jax.nn.sigmoid(s1)                          # Swish
    s2 = s1 @ w2.T + b2.reshape(1, -1)                    # (N, C)
    scale = jax.nn.sigmoid(s2)[:, :, None, None]          # (N, C, 1, 1)
    return x * scale


if __name__ == "__main__":
    # Small shapes consistent with the module: NCHW input.
    N, C, H, W = 2, 4, 16, 16
    reduction_ratio = 4
    Cr = max(1, C // reduction_ratio)

    key = jax.random.PRNGKey(0)
    kx, kw1, kb1, kw2, kb2 = jax.random.split(key, 5)

    x = jax.random.normal(kx, (N, C, H, W), dtype=jnp.float32)

    # Conv2d 1x1 weights stored squeezed: (out, in); biases PyTorch-style 1-D.
    w1 = 0.1 * jax.random.normal(kw1, (Cr, C), dtype=jnp.float32)
    b1 = 0.1 * jax.random.normal(kb1, (Cr,), dtype=jnp.float32)
    w2 = 0.1 * jax.random.normal(kw2, (C, Cr), dtype=jnp.float32)
    b2 = 0.1 * jax.random.normal(kb2, (C,), dtype=jnp.float32)

    y = squeeze_excitation(x, w1, b1, w2, b2)
    y = jax.block_until_ready(y)

    y_ref = squeeze_excitation_ref(x, w1, b1, w2, b2)
    assert y.shape == (N, C, H, W)
    assert jnp.allclose(y, y_ref, atol=1e-5, rtol=1e-5)

    print("KERNEL_OK")
</pallas_src>

<mosaic_0001>
module attributes {stable_mosaic.version = 11 : i64} {
  func.func @_se_kernel(%arg0: i32, %arg1: memref<1x4x256xf32, #tpu.memory_space<vmem>>, %arg2: memref<4x1xf32, #tpu.memory_space<vmem>>, %arg3: memref<1x1xf32, #tpu.memory_space<vmem>>, %arg4: memref<1x4xf32, #tpu.memory_space<vmem>>, %arg5: memref<1x4xf32, #tpu.memory_space<vmem>>, %arg6: memref<1x4x256xf32, #tpu.memory_space<vmem>>) attributes {dimension_semantics = [#tpu.dimension_semantics<parallel>], iteration_bounds = array<i64: 2>, scalar_prefetch = 0 : i64, scratch_operands = 0 : i64, tpu.core_type = #tpu.core_type<tc>, window_params = [{transform_indices = @transform_0, window_bounds = array<i64: 1, 4, 256>}, {pipeline_mode = #tpu.pipeline_mode<synchronous>, transform_indices = @transform_1, window_bounds = array<i64: 4, 1>}, {pipeline_mode = #tpu.pipeline_mode<synchronous>, transform_indices = @transform_2, window_bounds = array<i64: 1, 1>}, {pipeline_mode = #tpu.pipeline_mode<synchronous>, transform_indices = @transform_3, window_bounds = array<i64: 1, 4>}, {pipeline_mode = #tpu.pipeline_mode<synchronous>, transform_indices = @transform_4, window_bounds = array<i64: 1, 4>}, {transform_indices = @transform_5, window_bounds = array<i64: 1, 4, 256>}]} {
    %c0 = arith.constant 0 : index
    %c0_0 = arith.constant 0 : index
    %c0_1 = arith.constant 0 : index
    %0 = vector.load %arg1[%c0, %c0_0, %c0_1] : memref<1x4x256xf32, #tpu.memory_space<vmem>>, vector<1x4x256xf32>
    %cst = arith.constant dense<0.000000e+00> : vector<1x4xf32>
    %1 = vector.multi_reduction <add>, %0, %cst [2] : vector<1x4x256xf32> to vector<1x4xf32>
    %cst_2 = arith.constant 2.560000e+02 : f32
    %2 = vector.broadcast %cst_2 : f32 to vector<1x4xf32>
    %3 = arith.divf %1, %2 : vector<1x4xf32>
    %c0_3 = arith.constant 0 : index
    %c0_4 = arith.constant 0 : index
    %4 = vector.load %arg2[%c0_3, %c0_4] : memref<4x1xf32, #tpu.memory_space<vmem>>, vector<4x1xf32>
    %cst_5 = arith.constant dense<0.000000e+00> : vector<1x1xf32>
    %5 = tpu.matmul %3, %4, %cst_5 {dimension_numbers = #tpu.dot_dimension_numbers<[1], [0], [0], [1], [0, 0, 1, 1], [], []>} : vector<1x4xf32>, vector<4x1xf32>, vector<1x1xf32> -> vector<1x1xf32>
    %c0_6 = arith.constant 0 : index
    %c0_7 = arith.constant 0 : index
    %6 = vector.load %arg3[%c0_6, %c0_7] : memref<1x1xf32, #tpu.memory_space<vmem>>, vector<1x1xf32>
    %7 = arith.addf %5, %6 : vector<1x1xf32>
    %8 = arith.negf %7 : vector<1x1xf32>
    %9 = math.exp %8 : vector<1x1xf32>
    %cst_8 = arith.constant 1.000000e+00 : f32
    %10 = vector.broadcast %cst_8 : f32 to vector<1x1xf32>
    %11 = arith.addf %10, %9 : vector<1x1xf32>
    %12 = arith.divf %10, %11 : vector<1x1xf32>
    %13 = arith.mulf %7, %12 : vector<1x1xf32>
    %c0_9 = arith.constant 0 : index
    %c0_10 = arith.constant 0 : index
    %14 = vector.load %arg4[%c0_9, %c0_10] : memref<1x4xf32, #tpu.memory_space<vmem>>, vector<1x4xf32>
    %cst_11 = arith.constant dense<0.000000e+00> : vector<1x4xf32>
    %15 = tpu.matmul %13, %14, %cst_11 {dimension_numbers = #tpu.dot_dimension_numbers<[1], [0], [0], [1], [0, 0, 1, 1], [], []>} : vector<1x1xf32>, vector<1x4xf32>, vector<1x4xf32> -> vector<1x4xf32>
    %c0_12 = arith.constant 0 : index
    %c0_13 = arith.constant 0 : index
    %16 = vector.load %arg5[%c0_12, %c0_13] : memref<1x4xf32, #tpu.memory_space<vmem>>, vector<1x4xf32>
    %17 = arith.addf %15, %16 : vector<1x4xf32>
    %18 = arith.negf %17 : vector<1x4xf32>
    %19 = math.exp %18 : vector<1x4xf32>
    %cst_14 = arith.constant 1.000000e+00 : f32
    %20 = vector.broadcast %cst_14 : f32 to vector<1x4xf32>
    %21 = arith.addf %20, %19 : vector<1x4xf32>
    %22 = arith.divf %20, %21 : vector<1x4xf32>
    %c0_15 = arith.constant 0 : index
    %c0_16 = arith.constant 0 : index
    %c0_17 = arith.constant 0 : index
    %23 = vector.load %arg1[%c0_15, %c0_16, %c0_17] : memref<1x4x256xf32, #tpu.memory_space<vmem>>, vector<1x4x256xf32>
    %24 = vector.shape_cast %22 : vector<1x4xf32> to vector<1x4x1xf32>
    %25 = vector.broadcast %24 : vector<1x4x1xf32> to vector<1x4x256xf32>
    %26 = arith.mulf %23, %25 : vector<1x4x256xf32>
    %c0_18 = arith.constant 0 : index
    %c0_19 = arith.constant 0 : index
    %c0_20 = arith.constant 0 : index
    %27 = vector.load %arg6[%c0_18, %c0_19, %c0_20] : memref<1x4x256xf32, #tpu.memory_space<vmem>>, vector<1x4x256xf32>
    tpu.vector_store %arg6[%c0_18, %c0_19, %c0_20], %26 {strides = array<i32>} : memref<1x4x256xf32, #tpu.memory_space<vmem>>, vector<1x4x256xf32>,
    return
  }
  func.func @transform_0(%arg0: i32) -> (i32, i32, i32) {
    %c0_i32 = arith.constant 0 : i32
    %c0_i32_0 = arith.constant 0 : i32
    %c0_i32_1 = arith.constant 0 : i32
    return %arg0, %c0_i32, %c0_i32_0 : i32, i32, i32
  }
  func.func @transform_1(%arg0: i32) -> (i32, i32) {
    %c0_i32 = arith.constant 0 : i32
    %c0_i32_0 = arith.constant 0 : i32
    %c0_i32_1 = arith.constant 0 : i32
    return %c0_i32, %c0_i32_0 : i32, i32
  }
  func.func @transform_2(%arg0: i32) -> (i32, i32) {
    %c0_i32 = arith.constant 0 : i32
    %c0_i32_0 = arith.constant 0 : i32
    %c0_i32_1 = arith.constant 0 : i32
    return %c0_i32, %c0_i32_0 : i32, i32
  }
  func.func @transform_3(%arg0: i32) -> (i32, i32) {
    %c0_i32 = arith.constant 0 : i32
    %c0_i32_0 = arith.constant 0 : i32
    %c0_i32_1 = arith.constant 0 : i32
    return %c0_i32, %c0_i32_0 : i32, i32
  }
  func.func @transform_4(%arg0: i32) -> (i32, i32) {
    %c0_i32 = arith.constant 0 : i32
    %c0_i32_0 = arith.constant 0 : i32
    %c0_i32_1 = arith.constant 0 : i32
    return %c0_i32, %c0_i32_0 : i32, i32
  }
  func.func @transform_5(%arg0: i32) -> (i32, i32, i32) {
    %c0_i32 = arith.constant 0 : i32
    %c0_i32_0 = arith.constant 0 : i32
    %c0_i32_1 = arith.constant 0 : i32
    return %arg0, %c0_i32, %c0_i32_0 : i32, i32, i32
  }
}

</mosaic_0001>

<bundles_post_ra>
// kernel: tpu_custom_call.1
= control target key start
LH: loop header
LB: loop body
LE: loop exit
PB: predicated region body
PF: predicated region fallthrough
CT: control target
= control target key end

     0   :  { %s916_s0 = inlined_call_operand.hbm [shape: f32[2,4,256], index: 0, kind: input, shape index: {}]   ;;  %s917_s1 = inlined_call_operand.vmem [shape: f32[4,1], index: 1, kind: input, shape index: {}]   ;;  %s918_s2 = inlined_call_operand.<no memory space> [shape: f32[1,1], index: 2, kind: input, shape index: {}]   ;;  %s919_s3 = inlined_call_operand.vmem [shape: f32[1,4], index: 3, kind: input, shape index: {}]   ;;  %s920_s4 = inlined_call_operand.vmem [shape: f32[1,4], index: 4, kind: input, shape index: {}]   ;;  %s921_s5 = inlined_call_operand.hbm [shape: f32[2,4,256], index: 5, kind: output, shape index: {}]  }
   0x1   :  { %v10_v0 = vstv %s918_s2 }
   0x2   :  { %11 = vst [vmem:[#allocation2] sm:$0x1] %v10_v0 }
   0x3   :  { %12 = vsyncpa [#allocation4], 0 }
   0x4   :  { %14 = vsyncpa [#allocation4 + $0x1], 0 }
   0x5   :  { %15 = vsyncpa [#allocation5], 0 }
   0x6   :  { %17 = vsyncpa [#allocation5 + $0x1], 0  ;;  %s762_s20 = smov 0   ;;  %s764_s21 = smov 0  }
   0x7   :  { %s766_s22 = smov 0   ;;  %s768_s23 = smov 0  }
   0x8 LB: > { %s783_s2 = sadd.s32 4294967295, %s722_s23   ;;  %s536_s24 = sadd.s32 4294967294, %s722_s23   ;;  %s722_s23 = sphi %s768_s23, %s938_s23   ;;  %s718_s22 = sphi %s766_s22, %s937_s22   ;;  %s714_s21 = sphi %s764_s21, %s936_s21   ;;  %s710_s20 = sphi %s762_s20, %s935_s20  }
   0x9   : > { %s787_s25 = sadd.s32 1, %s722_s23   ;;  %s30_s26 = sadd.s32 1, %s718_s22 }
   0xa   : > { %s27_s27 = ssub.s32 %s722_s23, %s787_s25  ;;  %p37_p0 = scmp.ne.s32.totalorder %s718_s22, %s714_s21 }
   0xb   : > { %p28_p1 = scmp.eq.s32.totalorder %s27_s27, 0  ;;  %p38_p2 = scmp.eq.s32.totalorder %s722_s23, 0 }
   0xc   : > { %p43_p3 = scmp.ne.s32.totalorder %s714_s21, %s710_s20  ;;  %p44_p4 = scmp.eq.s32.totalorder %s783_s2, 0 }
   0xd   : > { %s799_s28 = scalar_select %p28_p1, %s718_s22, %s30_s26  }
   0xe   : > { %p801_p5 = por %p38_p2, %p37_p0  ;;  %p805_p6 = por %p44_p4, %p43_p3 }
   0xf   : > { %p151_p7 = scmp.eq.s32.totalorder %s783_s2, 1  ;;  %p157_p8 = scmp.eq.s32.totalorder %s536_s24, 1 }
  0x10   : > { %s925_s30 = scalar_select %p805_p6, 1, 0 }
  0x11   : > { %p584_p10 = scmp.lt.s32.totalorder %s722_s23, 2  ;;  %p812_p11 = por %p151_p7, %p37_p0 }
  0x12   : > { %p816_p12 = por %p157_p8, %p43_p3  ;;  %s189_s8 = sand.u32 1, %s718_s22  }
  0x13   : > { %s926_s6 = scalar_select %p812_p11, 1, 0 }
  0x14   : > { %s927_s7 = scalar_select %p816_p12, 1, 0 }
  0x15   : > { %s556_s9 = sshll.u32 %s722_s23, 7  ;;  %s539_s10 = sshll.u32 %s189_s8, 3 }
  0x16   : > { %s825_s13 = scalar_lea.hbm %s916_s0, %s556_s9  ;;  %s193_s14 = scalar_lea.vmem [#allocation3], %s539_s10 }
  0x17   : > { %s201_s15 = sshll.u32 %s193_s14, 4  ;;  %p829_p13 = pnand %p584_p10, %p801_p5  ;;  %s833_s15 = int_to_ptr.vmem [resolvable:$true] %s201_s15 }
  0x18   : > { %s190_s17 = scalar_lea.sflag [#allocation4], %s189_s8  ;;  %s630_s18 = scalar_lea.hbm %s825_s13, 128 }
  0x19   : > { %p631_p2 = scmp.ne.s32.totalorder %s825_s13, %s630_s18  ;;  %p632_p3 = pneg %p829_p13 }
  0x1a   : > { %s635_s26 = scalar_lea.hbm %s916_s0, 256  ;;  %p636_p5 = scmp.lt.s32.totalorder %s825_s13, %s916_s0 }
  0x1b   : > { %p633_p4 = pnand %p632_p3, %p631_p2  ;;  %p637_p8 = scmp.lt.s32.totalorder %s635_s26, %s630_s18 }
  0x1d   : > { %p634_p7 = pneg %p633_p4  ;;  %p638_p10 = por %p637_p8, %p636_p5 }
  0x1f   : > { %p639_p9 = pnand %p638_p10, %p634_p7 }
  0x21   : > { %642 = shalt.err (!%p639_p9)
}
  0x22   : > { %s643_s8 = scalar_lea.vmem %s833_s15, 128  ;;  %s724_s9 = smov [#allocation3]  }
  0x23   : > { %p644_p0 = scmp.ne.s32.totalorder %s833_s15, %s643_s8  ;;  %s648_s10 = sshll.u32 %s724_s9, 4  ;;  %s649_s10 = int_to_ptr.vmem [resolvable:$false] %s648_s10 }
  0x24   : > { %s650_s11 = scalar_lea.vmem %s649_s10, 256  ;;  %p651_p4 = scmp.lt.s32.totalorder %s833_s15, %s649_s10 }
  0x25   : > { %p646_p1 = pnand %p644_p0, %p632_p3  ;;  %p652_p12 = scmp.lt.s32.totalorder %s650_s11, %s643_s8 }
  0x27   : > { %p647_p2 = pneg %p646_p1  ;;  %p653_p11 = por %p652_p12, %p651_p4 }
  0x29   : > { %p654_p6 = pnand %p653_p11, %p647_p2 }
  0x2b   : > { %657 = shalt.err (!%p654_p6)
}
  0x2c   : > { %579 = dma.hbm_to_vmem [thread:$0]  (!%p829_p13), %s825_s13, 128, %s833_s15, %s190_s17  }
  0x2d   : > { %p929_p9 = scmp.lt.s32.totalorder %s722_s23, 3  ;;  %p930_p7 = scmp.ge.s32.totalorder %s722_s23, 1 }
  0x2f   : > { %p207_p0 = pnand %p930_p7, %p929_p9 }
  0x30   : > { %s860_s12 = sand.u32 (!%p207_p0), 1, %s714_s21   ;;  %p931_p6 = scmp.ne.s32.totalorder (!%p207_p0), %s925_s30, 0 }
  0x31   : > { %210 = sbr.rel (%p207_p0) target bundleno = 793 (0x319), region = 40  ;;  %s543_s14 = sshll.u32 (!%p207_p0), %s860_s12, 3 }
  0x32   : > { %s213_s18 = scalar_lea.sflag (!%p207_p0), [#allocation4], %s860_s12  ;;  %s216_s16 = scalar_lea.vmem (!%p207_p0), [#allocation3], %s543_s14 }
  0x36   : > { %701 = dma.done.wait (%p931_p6), %s213_s18, 128  }
  0x37   : > { %703 = vsyncadd (%p931_p6), %s213_s18, 4294967168  ;;  %vm247_vm0 = vcmask 1043456   ;;  %v243_v1 = vld [vmem:[%s216_s16] sm:$0xff]  ;;  %v725_v6 = vmov 0.0   ;;  %vm726_vm1 = vmmov 0   ;;  %v258_v8 = vlaneseq  ;;  %s557_s26 = sshll.u32 %s783_s2, 7 }
  0x38   : > { %v245_v2 = vcombine.high %v243_v1, %v243_v1  ;;  %v248_v3 = vsel %vm247_vm0, %v243_v1, 0.0  ;;  %562 = vmatprep.subr.mxu0 %v725_v6  ;;  %v255_v7 = vld [vmem:[%s917_s1] sm:$0xf]  ;;  %567 = vmatprep.subr.mxu1 %v725_v6  ;;  %vm264_vm2 = vcmask 31744   ;;  %vm353_vm3 = vcmask 1040384   ;;  %s242_s27 = scalar_lea.vmem [#allocation6], %s543_s14  ;;  %s464_s10 = scalar_lea.hbm %s921_s5, %s557_s26 }
  0x39   : > { %563 = vmatpush3.msk.msra.mxu0 %vm247_vm0, %v255_v7  ;;  %564 = vmatprep.mubr.msk.f32.mxu0 %vm726_vm1, %v725_v6  ;;  %v259_v9 = vand.u32 127, %v258_v8  ;;  %v261_v10 = vshrl.u32 %v258_v8, 7  ;;  %v347_v15 = vld [vmem:[%s919_s3] sm:$0x1]  ;;  %vm349_vm4 = vcmask 7168   ;;  %s466_s29 = sshll.u32 %s242_s27, 4  ;;  %s467_s29 = int_to_ptr.vmem [resolvable:$true] %s466_s29 }
  0x3a   : > { %v249_v4 = vsel %vm247_vm0, %v245_v2, 0.0  ;;  %569 = vmatprep.mubr.msk.f32.mxu1 %vm726_vm1, %v725_v6  ;;  %568 = vmatpush3.msk.msra.mxu1 %vm353_vm3, %v347_v15  ;;  %v256_v16 = vld [vmem:[#allocation2] sm:$0x1]  ;;  %v727_v35 = vmov 839922192   ;;  %s452_s11 = scalar_lea.sflag [#allocation5], %s860_s12 }
  0x3b   : > { %v250_v5 = vadd.f32 %v249_v4, %v248_v3  ;;  %v262_v11 = vsub.s32 %v259_v9, %v261_v10  ;;  %v348_v25 = vld [vmem:[%s920_s4] sm:$0x1]  ;;  %v435_v32 = vsub.s32 0, %v261_v10  ;;  %v442_v36 = vunpack.c.l.s4 %v727_v35  ;;  %s658_s18 = scalar_lea.vmem %s467_s29, 128  ;;  %p932_p12 = scmp.ne.s32.totalorder %s926_s6, 0 }
  0x3c   : > { %p659_p11 = scmp.ne.s32.totalorder %s467_s29, %s658_s18  ;;  %s728_s16 = smov [#allocation6]  }
  0x3d   : > { %251 = vadd.xlane.f32.xlu0 %v250_v5  ;;  %v443_v37 = vunpack.c.0.s8 %v442_v36  ;;  %s662_s13 = sshll.u32 %s728_s16, 4  ;;  %s663_s13 = int_to_ptr.vmem [resolvable:$false] %s662_s13 }
  0x3e   : > { %p660_p13 = pnand %p659_p11, %p932_p12  ;;  %s664_s2 = scalar_lea.vmem %s663_s13, 256 }
  0x3f   : > { %v446_v38 = vsub.s32 %v443_v37, %v261_v10  ;;  %p665_p3 = scmp.lt.s32.totalorder %s467_s29, %s663_s13  ;;  %p666_p5 = scmp.lt.s32.totalorder %s664_s2, %s658_s18 }
  0x40   : > { %p661_p1 = pneg %p660_p13 }
  0x41   : > { %p667_p8 = por %p666_p5, %p665_p3 }
  0x43   : > { %p668_p10 = pnand %p667_p8, %p661_p1 }
  0xc6   : > { %v252_v12 = vpop.xlane.xlu0 %251 }
  0xc7   : > { %v254_v13 = vmul.f32 0.00390625, %v252_v12 }
  0xc9   : > { %v263_v14 = vrot.slane %v254_v13, %v262_v11 }
  0xcb   : > { %565 = vmatmul.mubr.msk.f32.vlgmr.msra.gmra.mxu0 %vm264_vm2, %v263_v14 }
 0x18b   : > { %v336_v17 = vpop.f32.mrf.mxu0 }
 0x18c   : > { %v337_v18 = vadd.f32 %v336_v17, %v256_v16 }
 0x18d   : > { %v566_v19 = vpop.f32.mrf.mxu0 }
 0x18e   : > { %v547_v20 = vmul.f32 -1.442695, %v337_v18 }
 0x190   : > { %622 = vpow2.f32 %v547_v20 }
 0x19d   : > { %v623_v21 = vpop.eup %622 }
 0x19e   : > { %v343_v22 = vadd.f32 1.0, %v623_v21 }
 0x1a0   : > { %624 = vrcp.f32 %v343_v22 }
 0x1ad   : > { %v625_v23 = vpop.eup %624 }
 0x1ae   : > { %v346_v24 = vmul.f32 %v625_v23, %v337_v18 }
 0x1b0   : > { %570 = vmatmul.mubr.msk.f32.vlgmr.msra.gmra.mxu1 %vm349_vm4, %v346_v24 }
 0x270   : > { %v423_v26 = vpop.f32.mrf.mxu1 }
 0x271   : > { %v424_v27 = vadd.f32 %v423_v26, %v348_v25 }
 0x272   : > { %v571_v28 = vpop.f32.mrf.mxu1 }
 0x273   : > { %v550_v29 = vmul.f32 -1.442695, %v424_v27 }
 0x275   : > { %626 = vpow2.f32 %v550_v29 }
 0x282   : > { %v627_v30 = vpop.eup %626 }
 0x283   : > { %v430_v31 = vadd.f32 1.0, %v627_v30 }
 0x285   : > { %628 = vrcp.f32 %v430_v31 }
 0x292   : > { %v629_v33 = vpop.eup %628 }
 0x293   : > { %v436_v34 = vrot.slane %v629_v33, %v435_v32 }
 0x295   : > { %438 = vbcast.lane.b32.xlu0 %v436_v34, 256 }
 0x307   : > { %v439_v39 = vpop.permute.xlu0 %438 }
 0x308   : > { %v447_v40 = vrot.slane %v439_v39, %v446_v38 }
 0x30a   : > { %v449_v41 = vmul.f32 %v447_v40, %v243_v1 }
 0x30c   : > { %450 = vst [vmem:[%s242_s27] sm:$0xff] %v449_v41 }
 0x30d   : > { %671 = shalt.err (!%p668_p10)
}
 0x30e   : > { %s672_s14 = scalar_lea.hbm %s464_s10, 128  ;;  %s676_s30 = scalar_lea.hbm %s921_s5, 256 }
 0x30f   : > { %p673_p2 = scmp.ne.s32.totalorder %s464_s10, %s672_s14  ;;  %p677_p7 = scmp.lt.s32.totalorder %s464_s10, %s921_s5 }
 0x310   : > { %p678_p0 = scmp.lt.s32.totalorder %s676_s30, %s672_s14 }
 0x311   : > { %p674_p4 = pnand %p673_p2, %p932_p12 }
 0x312   : > { %p679_p6 = por %p678_p0, %p677_p7 }
 0x313   : > { %p675_p9 = pneg %p674_p4 }
 0x315   : > { %p680_p11 = pnand %p679_p6, %p675_p9 }
 0x317   : > { %683 = shalt.err (!%p680_p11)
}
 0x318   : > { %574 = dma.vmem_to_hbm [thread:$0]  (%p932_p12), %s467_s29, 128, %s464_s10, %s452_s11  }
 0x319 PF: > { %s478_s24 = sand.u32 1, %s710_s20   ;;  %p933_p13 = scmp.ne.s32.totalorder %s927_s7, 0 }
 0x31a   : > { %p934_p1 = scmp.ge.s32.totalorder %s722_s23, 2  ;;  %s479_s26 = scalar_lea.sflag [#allocation5], %s478_s24 }
 0x31c   : > { %p581_p3 = pnand %p934_p1, %p933_p13 }
 0x31e   : > { %p582_p5 = pneg %p581_p3 }
 0x320   : > { %705 = dma.done.wait (%p582_p5), %s479_s26, 128  }
 0x321   : > { %707 = vsyncadd (%p582_p5), %s479_s26, 4294967168  ;;  %p20_p8 = scmp.ge.s32.totalorder %s787_s25, 4   ;;  %s935_s20 = smov %s714_s21 }
 0x322   : > { %s936_s21 = smov %s718_s22  ;;  %s937_s22 = smov %s799_s28 }
 0x323   : > { %s938_s23 = smov %s787_s25  ;;  %22 = sbr.rel (!%p20_p8) target bundleno = 8 (0x8), region = 85 }
 0x328   :  { %484 = vsyncpa [#allocation4], 1 }
 0x329   :  { %486 = vsyncpa [#allocation4 + $0x1], 1 }
 0x32a   :  { %487 = vsyncpa [#allocation5], 1 }
 0x32b   :  { %489 = vsyncpa [#allocation5 + $0x1], 1 }

</bundles_post_ra>
